<compile_context>
chip_gen: v6e
topology: v6e:2x2x1
jax: 0.10.0
libtpu: 0.0.40
codegen_flags: <defaults>
</compile_context>

<pallas_src>
import functools
import math

import numpy as np
import jax
import jax.numpy as jnp
from jax import lax
from jax.experimental import pallas as pl
from jax.experimental.pallas import tpu as pltpu


def _qkv_attention_kernel(q_ref, k_ref, v_ref, o_ref, *, logit_scale):
    # Refs are (1, ch, T) blocks for the current (batch, head) grid point.
    q = q_ref[0]                                              # [ch, T], input dtype
    k = k_ref[0]                                              # [ch, T]
    v = v_ref[0]                                              # [ch, T]

    # logits[t, s] = (1/sqrt(ch)) * sum_c q[c, t] * k[c, s]   (scale applied once)
    logits = lax.dot_general(
        q, k, (((0,), (0,)), ((), ())),
        preferred_element_type=jnp.float32) * logit_scale     # [T, T] f32 on MXU

    # Hand-rolled softmax over the key axis (f32 stats, EUP exp + approx reciprocal).
    m = jnp.max(logits, axis=-1, keepdims=True)               # [T, 1]
    p = jnp.exp(logits - m)                                   # [T, T]
    l = jnp.sum(p, axis=-1, keepdims=True)                    # [T, 1]
    p = (p * pl.reciprocal(l, approx=True)).astype(v.dtype)   # normalized probs, input dtype

    # a[c, t] = sum_s v[c, s] * p[t, s]
    a = lax.dot_general(
        v, p, (((1,), (1,)), ((), ())),
        preferred_element_type=jnp.float32)                   # [ch, T] f32 acc

    o_ref[0] = a.astype(o_ref.dtype)


def qkv_attention(qkv, n_heads):
    """Pallas forward for QKVAttention: qkv [B, 3*H*ch, T] -> [B, H*ch, T]."""
    B, width, T = qkv.shape
    assert width % (3 * n_heads) == 0, "width must be divisible by 3 * n_heads"
    ch = width // (3 * n_heads)
    H = n_heads

    # Per-head channel blocks must be sublane-aligned to avoid relayout copies.
    min_sublane = 16 if qkv.dtype == jnp.bfloat16 else 8
    assert ch % min_sublane == 0, (
        f"head channel dim {ch} must be a multiple of {min_sublane} for dtype {qkv.dtype}")

    logit_scale = 1.0 / math.sqrt(ch)                         # (ch^-1/4)^2
    kernel = functools.partial(_qkv_attention_kernel, logit_scale=logit_scale)

    out = pl.pallas_call(
        kernel,
        out_shape=jax.ShapeDtypeStruct((B, H * ch, T), qkv.dtype),
        grid=(B, H),
        in_specs=[
            # Q / K / V head slices come from the same packed qkv tensor.
            pl.BlockSpec((1, ch, T), lambda b, h: (b, h, 0)),
            pl.BlockSpec((1, ch, T), lambda b, h: (b, h + H, 0)),
            pl.BlockSpec((1, ch, T), lambda b, h: (b, h + 2 * H, 0)),
        ],
        out_specs=pl.BlockSpec((1, ch, T), lambda b, h: (b, h, 0)),
        compiler_params=pltpu.CompilerParams(
            dimension_semantics=("parallel", "parallel")),
    )(qkv, qkv, qkv)
    return out


def reference_qkv_attention(qkv, n_heads):
    """Pure-JAX mirror of the PyTorch QKVAttention.forward."""
    B, width, T = qkv.shape
    ch = width // (3 * n_heads)
    q, k, v = jnp.split(qkv, 3, axis=1)
    scale = 1.0 / math.sqrt(math.sqrt(ch))
    q = (q * scale).reshape(B * n_heads, ch, T)
    k = (k * scale).reshape(B * n_heads, ch, T)
    v = v.reshape(B * n_heads, ch, T)
    w = jnp.einsum("bct,bcs->bts", q, k)
    w = jax.nn.softmax(w.astype(jnp.float32), axis=-1).astype(qkv.dtype)
    a = jnp.einsum("bts,bcs->bct", w, v)
    return a.reshape(B, n_heads * ch, T)


if __name__ == "__main__":
    key = jax.random.PRNGKey(0)
    B, n_heads, ch, T = 2, 4, 16, 128                         # width = 3*H*ch = 192
    qkv = jax.random.normal(key, (B, 3 * n_heads * ch, T), dtype=jnp.float32)

    out = qkv_attention(qkv, n_heads)
    out = jax.block_until_ready(out)

    ref = reference_qkv_attention(qkv, n_heads)
    # Tolerance covers the EUP approximate reciprocal used for softmax normalization.
    np.testing.assert_allclose(np.asarray(out), np.asarray(ref), rtol=2e-3, atol=2e-3)
    print("KERNEL_OK")
</pallas_src>

<mosaic_0001>
module attributes {stable_mosaic.version = 11 : i64} {
  func.func @_qkv_attention_kernel(%arg0: i32, %arg1: i32, %arg2: memref<1x16x128xf32, #tpu.memory_space<vmem>>, %arg3: memref<1x16x128xf32, #tpu.memory_space<vmem>>, %arg4: memref<1x16x128xf32, #tpu.memory_space<vmem>>, %arg5: memref<1x16x128xf32, #tpu.memory_space<vmem>>) attributes {dimension_semantics = [#tpu.dimension_semantics<parallel>, #tpu.dimension_semantics<parallel>], iteration_bounds = array<i64: 2, 4>, scalar_prefetch = 0 : i64, scratch_operands = 0 : i64, tpu.core_type = #tpu.core_type<tc>, window_params = [{transform_indices = @transform_0, window_bounds = array<i64: 1, 16, 128>}, {transform_indices = @transform_1, window_bounds = array<i64: 1, 16, 128>}, {transform_indices = @transform_2, window_bounds = array<i64: 1, 16, 128>}, {transform_indices = @transform_3, window_bounds = array<i64: 1, 16, 128>}]} {
    %c0 = arith.constant 0 : index
    %c0_0 = arith.constant 0 : index
    %c0_1 = arith.constant 0 : index
    %0 = vector.load %arg2[%c0, %c0_0, %c0_1] : memref<1x16x128xf32, #tpu.memory_space<vmem>>, vector<1x16x128xf32>
    %1 = vector.shape_cast %0 : vector<1x16x128xf32> to vector<16x128xf32>
    %c0_2 = arith.constant 0 : index
    %c0_3 = arith.constant 0 : index
    %c0_4 = arith.constant 0 : index
    %2 = vector.load %arg3[%c0_2, %c0_3, %c0_4] : memref<1x16x128xf32, #tpu.memory_space<vmem>>, vector<1x16x128xf32>
    %3 = vector.shape_cast %2 : vector<1x16x128xf32> to vector<16x128xf32>
    %c0_5 = arith.constant 0 : index
    %c0_6 = arith.constant 0 : index
    %c0_7 = arith.constant 0 : index
    %4 = vector.load %arg4[%c0_5, %c0_6, %c0_7] : memref<1x16x128xf32, #tpu.memory_space<vmem>>, vector<1x16x128xf32>
    %5 = vector.shape_cast %4 : vector<1x16x128xf32> to vector<16x128xf32>
    %cst = arith.constant dense<0.000000e+00> : vector<128x128xf32>
    %6 = tpu.matmul %1, %3, %cst {dimension_numbers = #tpu.dot_dimension_numbers<[0], [0], [1], [1], [0, 1, 1, 1], [], []>} : vector<16x128xf32>, vector<16x128xf32>, vector<128x128xf32> -> vector<128x128xf32>
    %cst_8 = arith.constant 2.500000e-01 : f32
    %7 = vector.broadcast %cst_8 : f32 to vector<128x128xf32>
    %8 = arith.mulf %6, %7 : vector<128x128xf32>
    %cst_9 = arith.constant dense<0xFF800000> : vector<128xf32>
    %9 = vector.multi_reduction <maximumf>, %8, %cst_9 [1] : vector<128x128xf32> to vector<128xf32>
    %10 = vector.shape_cast %9 : vector<128xf32> to vector<128x1xf32>
    %11 = vector.broadcast %10 : vector<128x1xf32> to vector<128x128xf32>
    %12 = arith.subf %8, %11 : vector<128x128xf32>
    %13 = math.exp %12 : vector<128x128xf32>
    %cst_10 = arith.constant dense<0.000000e+00> : vector<128xf32>
    %14 = vector.multi_reduction <add>, %13, %cst_10 [1] : vector<128x128xf32> to vector<128xf32>
    %15 = vector.shape_cast %14 : vector<128xf32> to vector<128x1xf32>
    %16 = tpu.reciprocal %15 {approx = true} : vector<128x1xf32> -> vector<128x1xf32>
    %17 = vector.broadcast %16 : vector<128x1xf32> to vector<128x128xf32>
    %18 = arith.mulf %13, %17 : vector<128x128xf32>
    %cst_11 = arith.constant dense<0.000000e+00> : vector<16x128xf32>
    %19 = tpu.matmul %5, %18, %cst_11 {dimension_numbers = #tpu.dot_dimension_numbers<[1], [1], [0], [0], [0, 0, 1, 0], [], []>} : vector<16x128xf32>, vector<128x128xf32>, vector<16x128xf32> -> vector<16x128xf32>
    %c0_12 = arith.constant 0 : index
    %c0_13 = arith.constant 0 : index
    %c0_14 = arith.constant 0 : index
    %20 = vector.load %arg5[%c0_12, %c0_13, %c0_14] : memref<1x16x128xf32, #tpu.memory_space<vmem>>, vector<1x16x128xf32>
    %21 = vector.shape_cast %20 : vector<1x16x128xf32> to vector<16x128xf32>
    %22 = vector.shape_cast %19 : vector<16x128xf32> to vector<1x16x128xf32>
    tpu.vector_store %arg5[%c0_12, %c0_13, %c0_14], %22 {strides = array<i32>} : memref<1x16x128xf32, #tpu.memory_space<vmem>>, vector<1x16x128xf32>,
    return
  }
  func.func @transform_0(%arg0: i32, %arg1: i32) -> (i32, i32, i32) {
    %c0_i32 = arith.constant 0 : i32
    %c0_i32_0 = arith.constant 0 : i32
    return %arg0, %arg1, %c0_i32 : i32, i32, i32
  }
  func.func @transform_1(%arg0: i32, %arg1: i32) -> (i32, i32, i32) {
    %c4_i32 = arith.constant 4 : i32
    %0 = arith.addi %arg1, %c4_i32 : i32
    %c0_i32 = arith.constant 0 : i32
    %c0_i32_0 = arith.constant 0 : i32
    return %arg0, %0, %c0_i32 : i32, i32, i32
  }
  func.func @transform_2(%arg0: i32, %arg1: i32) -> (i32, i32, i32) {
    %c8_i32 = arith.constant 8 : i32
    %0 = arith.addi %arg1, %c8_i32 : i32
    %c0_i32 = arith.constant 0 : i32
    %c0_i32_0 = arith.constant 0 : i32
    return %arg0, %0, %c0_i32 : i32, i32, i32
  }
  func.func @transform_3(%arg0: i32, %arg1: i32) -> (i32, i32, i32) {
    %c0_i32 = arith.constant 0 : i32
    %c0_i32_0 = arith.constant 0 : i32
    return %arg0, %arg1, %c0_i32 : i32, i32, i32
  }
}

</mosaic_0001>

<bundles_post_ra>
// kernel: tpu_custom_call.1
= control target key start
LH: loop header
LB: loop body
LE: loop exit
PB: predicated region body
PF: predicated region fallthrough
CT: control target
= control target key end

     0   :  { %s2013_s0 = inlined_call_operand.hbm [shape: f32[2,192,128], index: 0, kind: input, shape index: {}]   ;;  %s2014_s1 = inlined_call_operand.hbm [shape: f32[2,192,128], index: 1, kind: input, shape index: {}]   ;;  %s2015_s2 = inlined_call_operand.hbm [shape: f32[2,192,128], index: 2, kind: input, shape index: {}]   ;;  %s2016_s3 = inlined_call_operand.hbm [shape: f32[2,64,128], index: 3, kind: output, shape index: {}]  }
   0x1   :  { %2034 = sst [smem:[#allocation22_spill]] %s2013_s0 }
   0x2   :  { %2035 = sst [smem:[#allocation23_spill]] %s2014_s1 }
   0x3   :  { %2036 = sst [smem:[#allocation24_spill]] %s2015_s2 }
   0x4   :  { %2037 = sst [smem:[#allocation25_spill]] %s2016_s3 }
   0x5   :  { %8 = vsyncpa [#allocation3], 0 }
   0x6   :  { %10 = vsyncpa [#allocation3 + $0x1], 0 }
   0x7   :  { %11 = vsyncpa [#allocation6], 0 }
   0x8   :  { %13 = vsyncpa [#allocation6 + $0x1], 0 }
   0x9   :  { %14 = vsyncpa [#allocation4], 0 }
   0xa   :  { %16 = vsyncpa [#allocation4 + $0x1], 0  ;;  %s1543_s12 = smov 0   ;;  %s1545_s13 = smov 0  }
   0xb   :  { %s1547_s14 = smov 0   ;;  %s1549_s15 = smov 0  }
   0xc   :  { %s1551_s16 = smov 0   ;;  %s1553_s17 = smov 0  }
   0xd   :  { %s1555_s18 = smov 0   ;;  %s1557_s19 = smov 0  }
   0xe   :  { %s1559_s20 = smov 0   ;;  %s1561_s21 = smov 0  }
   0xf   :  { %s1563_s22 = smov 0   ;;  %s1565_s23 = smov 0  }
  0x10   :  { %s1567_s24 = smov 0   ;;  %s1569_s25 = smov 0  }
  0x11 LB: > { %2038 = sst [smem:[#allocation13_spill]] %s1477_s16  ;;  %s1614_s26 = sadd.s32 4294967295, %s1513_s25   ;;  %s1513_s25 = sphi %s1569_s25, %s22_s25   ;;  %s1509_s24 = sphi %s1567_s24, %s2083_s24   ;;  %s1505_s23 = sphi %s1565_s23, %s2082_s23   ;;  %s1501_s22 = sphi %s1563_s22, %s2081_s22   ;;  %s1497_s21 = sphi %s1561_s21, %s2080_s21   ;;  %s1493_s20 = sphi %s1559_s20, %s2091_s20   ;;  %s1489_s19 = sphi %s1557_s19, %s2090_s19   ;;  %s1485_s18 = sphi %s1555_s18, %s2089_s18   ;;  %s1481_s17 = sphi %s1553_s17, %s2088_s17   ;;  %s1477_s16 = sphi %s1551_s16, %s2087_s16   ;;  %s1473_s15 = sphi %s1549_s15, %s2078_s15   ;;  %s1469_s14 = sphi %s1547_s14, %s2086_s14   ;;  %s1465_s13 = sphi %s1545_s13, %s2085_s13   ;;  %s1461_s12 = sphi %s1543_s12, %s2084_s12  }
  0x12   : > { %2039 = sst [smem:[#allocation14_spill]] %s1497_s21  ;;  %s31_s27 = sadd.s32 1, %s1505_s23 }
  0x13   : > { %2040 = sst [smem:[#allocation15_spill]] %s1501_s22  ;;  %p32_p0 = scmp.ge.s32.totalorder %s31_s27, 4 }
  0x14   : > { %2041 = sst [smem:[#allocation16_spill]] %s1505_s23  ;;  %s34_s28 = sadd.s32 1, %s1509_s24 }
  0x15   : > { %2042 = sst [smem:[#allocation17_spill]] %s1509_s24  ;;  %p2030_p1 = scmp.eq.s32.totalorder %s1513_s25, 0 }
  0x16   : > { %p2023_p2 = scmp.eq.s32.totalorder %s1614_s26, 0  ;;  %s2093_s27 = smov (%p32_p0, %s31_s27), 0 }
  0x17   : > { %2043 = sst [smem:[#allocation18_spill]] %s2093_s27  ;;  %s2095_s28 = smov (!%p32_p0, %s34_s28), %s1509_s24 }
  0x18   : > { %s66_s29 = sadd.s32 4, %s1505_s23  ;;  %s67_s30 = sadd.s32 4, %s2093_s27 }
  0x19   : > { %p36_p3 = scmp.ge.s32.totalorder %s2095_s28, 2  ;;  %s69_s4 = ssub.s32 %s66_s29, %s67_s30 }
  0x1a   : > { %s73_s5 = sadd.s32 1, %s1481_s17  ;;  %p80_p4 = scmp.ne.s32.totalorder %s1481_s17, %s1477_s16 }
  0x1b   : > { %s2097_s28 = smov (%p36_p3, %s2095_s28), 0  ;;  %p86_p6 = scmp.ne.s32.totalorder %s1477_s16, %s1473_s15 }
  0x1c   : > { %2044 = sst [smem:[#allocation19_spill]] %s2097_s28  ;;  %p1632_p5 = por %p80_p4, %p2030_p1 }
  0x1d   : > { %s1640_s7 = ssub.s32 %s1509_s24, %s2097_s28  ;;  %s96_s8 = sadd.s32 8, %s1505_s23 }
  0x1e   : > { %s70_s9 = sor.u32 %s69_s4, %s1640_s7  ;;  %p1646_p7 = por %p86_p6, %p2023_p2 }
  0x1f   : > { %p71_p8 = scmp.eq.s32.totalorder %s70_s9, 0  ;;  %s97_s11 = sadd.s32 8, %s2093_s27 }
  0x20   : > { %s2046_s10 = scalar_select %p1646_p7, 1, 0 }
  0x21   : > { %s99_s29 = ssub.s32 %s96_s8, %s97_s11  ;;  %p2022_p9 = scmp.lt.s32.totalorder %s1513_s25, 8 }
  0x22   : > { %2047 = sst [smem:[#allocation20_spill]] %s2046_s10  ;;  %s100_s15 = sor.u32 %s99_s29, %s1640_s7 }
  0x23   : > { %s1652_s30 = scalar_select %p71_p8, %s1481_s17, %s73_s5  }
  0x24   : > { %p1656_p10 = scmp.eq.s32.totalorder %s100_s15, 0  ;;  %s935_s4 = sshll.u32 %s1505_s23, 1 }
  0x25   : > { %2048 = sst [smem:[#allocation21_spill]] %s1652_s30  ;;  %s1069_s3 = smul.u32 24, %s1509_s24 }
  0x26   : > { %s191_s22 = sand.u32 1, %s1513_s25   ;;  %s193_s8 = sand.u32 1, %s1481_s17  }
  0x27   : > { %s178_s21 = sadd.s32 %s1069_s3, %s935_s4  ;;  %s937_s9 = sshll.u32 %s193_s8, 4 }
  0x28   : > { %s1663_s10 = sshll.u32 %s178_s21, 7  ;;  %s2050_s1 = sld [smem:[#allocation23_spill]] }
  0x29   : > { %s195_s16 = scalar_lea.vmem [#allocation5], %s937_s9  ;;  %p1674_p11 = pnand %p2022_p9, %p1632_p5 }
  0x2a   : > { %s205_s2 = sshll.u32 %s195_s16, 4  ;;  %p943_p12 = scmp.ge.s32.totalorder %s1513_s25, 1  ;;  %s206_s2 = int_to_ptr.vmem [resolvable:$true] %s205_s2 }
  0x2b   : > { %p237_p13 = scmp.lt.s32.totalorder %s1513_s25, 9  ;;  %s1680_s3 = scalar_lea.sflag [#allocation6], %s191_s22 }
  0x2c   : > { %p1277_p0 = pneg %p1674_p11  ;;  %s1288_s21 = scalar_lea.vmem %s206_s2, 256 }
  0x2d   : > { %p1289_p3 = scmp.ne.s32.totalorder %s206_s2, %s1288_s21  ;;  %s1515_s4 = smov [#allocation5]  }
  0x2e   : > { %s834_s29 = scalar_lea.hbm %s2050_s1, %s1663_s10  ;;  %s1293_s16 = sshll.u32 %s1515_s4, 4  ;;  %s1294_s16 = int_to_ptr.vmem [resolvable:$false] %s1293_s16 }
  0x2f   : > { %s835_s30 = scalar_lea.hbm %s834_s29, 1024  ;;  %p1291_p4 = pnand %p1289_p3, %p1277_p0 }
  0x30   : > { %s1295_s6 = scalar_lea.vmem %s1294_s16, 512  ;;  %p1296_p5 = scmp.lt.s32.totalorder %s206_s2, %s1294_s16 }
  0x31   : > { %p1292_p6 = pneg %p1291_p4  ;;  %p1297_p8 = scmp.lt.s32.totalorder %s1295_s6, %s1288_s21 }
  0x33   : > { %p1298_p9 = por %p1297_p8, %p1296_p5 }
  0x35   : > { %p1299_p2 = pnand %p1298_p9, %p1292_p6 }
  0x37   : > { %1302 = shalt.err (!%p1299_p2)
}
  0x38   : > { %s2024_s8 = smov 128   ;;  %s2026_s22 = smov 8  }
  0x39   : > { %1084 = dma.hbm_to_vmem [thread:$0]  (!%p1674_p11), %s835_s30, 256, %s206_s2, %s1680_s3, %s2024_s8, %s2024_s8, %s2026_s22  }
  0x3a   : > { %p1694_p2 = pnand %p943_p12, %p237_p13  ;;  %s931_s11 = sadd.s32 4294967294, %s1513_s25  }
  0x3b   : > { %s39_s5 = ssub.s32 %s1505_s23, %s2093_s27  ;;  %s43_s29 = sadd.s32 1, %s1493_s20 }
  0x3c   : > { %s40_s21 = sor.u32 %s39_s5, %s1640_s7  ;;  %p50_p9 = scmp.ne.s32.totalorder %s1493_s20, %s1489_s19 }
  0x3d   : > { %p41_p0 = scmp.eq.s32.totalorder %s40_s21, 0  ;;  %p56_p3 = scmp.ne.s32.totalorder %s1489_s19, %s1485_s18 }
  0x3e   : > { %p1709_p4 = por %p2030_p1, %p50_p9  ;;  %p142_p11 = scmp.eq.s32.totalorder %s1614_s26, 7 }
  0x3f   : > { %s1715_s2 = scalar_select %p41_p0, %s1493_s20, %s43_s29  }
  0x40   : > { %p2054_p12 = scmp.eq.s32.totalorder %s1614_s26, 0  ;;  %p1723_p6 = por %p142_p11, %p50_p9 }
  0x41   : > { %p148_p5 = scmp.eq.s32.totalorder %s931_s11, 7  ;;  %s168_s4 = sand.u32 1, %s1493_s20  }
  0x42   : > { %p1719_p13 = por %p2054_p12, %p56_p3  ;;  %s934_s16 = sshll.u32 %s168_s4, 4 }
  0x43   : > { %s2056_s7 = scalar_select %p1723_p6, 1, 0 }
  0x44   : > { %p1728_p8 = por %p148_p5, %p56_p3  ;;  %s2058_s0 = sld [smem:[#allocation22_spill]] }
  0x45   : > { %s172_s8 = scalar_lea.vmem [#allocation2], %s934_s16  ;;  %p2059_p0 = scmp.lt.s32.totalorder %s1513_s25, 8 }
  0x46   : > { %s2057_s6 = scalar_select %p1728_p8, 1, 0 }
  0x47   : > { %s181_s22 = sshll.u32 %s172_s8, 4  ;;  %p1740_p9 = pnand %p2059_p0, %p1709_p4  ;;  %s182_s22 = int_to_ptr.vmem [resolvable:$true] %s181_s22 }
  0x48   : > { %s169_s11 = scalar_lea.sflag [#allocation3], %s168_s4  ;;  %s1317_s27 = scalar_lea.vmem %s182_s22, 256 }
  0x49   : > { %p1306_p3 = pneg %p1740_p9  ;;  %p1318_p11 = scmp.ne.s32.totalorder %s182_s22, %s1317_s27 }
  0x4a   : > { %s180_s29 = scalar_lea.hbm %s2058_s0, %s1663_s10  ;;  %s1518_s24 = smov [#allocation2]  }
  0x4b   : > { %p1320_p12 = pnand %p1318_p11, %p1306_p3  ;;  %s1322_s5 = sshll.u32 %s1518_s24, 4  ;;  %s1323_s5 = int_to_ptr.vmem [resolvable:$false] %s1322_s5 }
  0x4c   : > { %s1324_s16 = scalar_lea.vmem %s1323_s5, 512  ;;  %p1325_p1 = scmp.lt.s32.totalorder %s182_s22, %s1323_s5 }
  0x4d   : > { %p1321_p5 = pneg %p1320_p12  ;;  %p1326_p8 = scmp.lt.s32.totalorder %s1324_s16, %s1317_s27 }
  0x4f   : > { %p1327_p6 = por %p1326_p8, %p1325_p1 }
  0x51   : > { %p1328_p7 = pnand %p1327_p6, %p1321_p5 }
  0x53   : > { %1331 = shalt.err (!%p1328_p7)
}
  0x54   : > { %s2061_s8 = smov 8   ;;  %s2062_s15 = smov 128  }
  0x55   : > { %1081 = dma.hbm_to_vmem [thread:$0]  (!%p1740_p9), %s180_s29, 256, %s182_s22, %s169_s11, %s2062_s15, %s2062_s15, %s2061_s8  }
  0x56   : > { %s103_s24 = sadd.s32 1, %s1469_s14  ;;  %p110_p1 = scmp.ne.s32.totalorder %s1469_s14, %s1465_s13 }
  0x57   : > { %s1755_s27 = scalar_select %p1656_p10, %s1469_s14, %s103_s24  }
  0x58   : > { %p116_p7 = scmp.ne.s32.totalorder %s1465_s13, %s1461_s12  ;;  %s217_s1 = sand.u32 1, %s1469_s14  }
  0x59   : > { %s2063_s5 = sld [smem:[#allocation24_spill]]  ;;  %p2064_p4 = scmp.eq.s32.totalorder %s1513_s25, 0 }
  0x5a   : > { %p2065_p8 = scmp.eq.s32.totalorder %s1614_s26, 0  ;;  %s940_s23 = sshll.u32 %s217_s1, 4 }
  0x5b   : > { %p112_p6 = por %p110_p1, %p2064_p4  ;;  %p2067_p9 = scmp.lt.s32.totalorder %s1513_s25, 8 }
  0x5c   : > { %p1770_p0 = por %p116_p7, %p2065_p8  ;;  %s219_s12 = scalar_lea.vmem [#allocation7], %s940_s23 }
  0x5d   : > { %p1776_p3 = pnand %p2067_p9, %p112_p6  ;;  %s229_s29 = sshll.u32 %s219_s12, 4  ;;  %s230_s29 = int_to_ptr.vmem [resolvable:$true] %s229_s29 }
  0x5e   : > { %s1519_s11 = smov [#allocation7]  }
  0x5f   : > { %s843_s16 = scalar_lea.hbm %s2063_s5, %s1663_s10  ;;  %p1334_p10 = pneg %p1776_p3 }
  0x60   : > { %s844_s22 = scalar_lea.hbm %s843_s16, 2048  ;;  %s1345_s10 = scalar_lea.vmem %s230_s29, 256 }
  0x61   : > { %p1346_p11 = scmp.ne.s32.totalorder %s230_s29, %s1345_s10  ;;  %s1350_s24 = sshll.u32 %s1519_s11, 4  ;;  %s1351_s24 = int_to_ptr.vmem [resolvable:$false] %s1350_s24 }
  0x62   : > { %s1352_s1 = scalar_lea.vmem %s1351_s24, 512  ;;  %p1353_p1 = scmp.lt.s32.totalorder %s230_s29, %s1351_s24 }
  0x63   : > { %p1348_p12 = pnand %p1346_p11, %p1334_p10  ;;  %p1354_p7 = scmp.lt.s32.totalorder %s1352_s1, %s1345_s10 }
  0x65   : > { %p1349_p5 = pneg %p1348_p12  ;;  %p1355_p4 = por %p1354_p7, %p1353_p1 }
  0x67   : > { %p1356_p6 = pnand %p1355_p4, %p1349_p5 }
  0x69   : > { %1359 = shalt.err (!%p1356_p6)
}
  0x6a   : > { %1087 = dma.hbm_to_vmem [thread:$0]  (!%p1776_p3), %s844_s22, 256, %s230_s29, %s1680_s3, %s2062_s15, %s2062_s15, %s2061_s8  }
  0x6b   : > { %241 = sbr.rel (%p1694_p2) target bundleno = 1091 (0x443), region = 32  ;;  %s1791_s23 = sand.u32 (!%p1694_p2), 1, %s1489_s19  }
  0x6c   : > { %s944_s4 = sshll.u32 (!%p1694_p2), %s1791_s23, 4  ;;  %s244_s21 = scalar_lea.sflag (!%p1694_p2), [#allocation3], %s1791_s23 }
  0x6d   : > { %s247_s5 = scalar_lea.vmem (!%p1694_p2), [#allocation2], %s944_s4 }
  0x70   : > { %1444 = dma.done.wait (%p1719_p13), %s244_s21, 256  }
  0x71   : > { %1446 = vsyncadd (%p1719_p13), %s244_s21, 4294967040  ;;  %s2069_s3 = sld [smem:[#allocation13_spill]]  ;;  %s252_s8 = sand.u32 1, %s1614_s26  }
  0x72   : > { %s2070_s9 = sld [smem:[#allocation20_spill]]  ;;  %s253_s22 = scalar_lea.sflag [#allocation6], %s252_s8 }
  0x77   : > { %s254_s15 = sand.u32 1, %s2069_s3  }
  0x78   : > { %s945_s16 = sshll.u32 %s254_s15, 4  ;;  %p2071_p2 = scmp.ne.s32.totalorder %s2070_s9, 0 }
  0x79   : > { %s256_s28 = scalar_lea.vmem [#allocation5], %s945_s16 }
  0x7a   : > { %1448 = dma.done.wait (%p2071_p2), %s253_s22, 256  }
  0x7b   : > { %1450 = vsyncadd (%p2071_p2), %s253_s22, 4294967040  ;;  %s263_s12 = sand.u32 1, %s1465_s13  }
  0x7c   : > { %s1808_s29 = sshll.u32 %s263_s12, 4 }
  0x7d   : > { %s265_s30 = scalar_lea.vmem [#allocation7], %s1808_s29 }
  0x7e   : > { %1452 = dma.done.wait (%p1770_p0), %s253_s22, 256  }
  0x7f   : > { %1454 = vsyncadd (%p1770_p0), %s253_s22, 4294967040  ;;  %v304_v0 = vld [vmem:[%s247_s5] sm:$0xff]  ;;  %v307_v1 = vld [vmem:[%s256_s28 + $0x8] sm:$0xff]  ;;  %vm342_vm0 = vcmask 130048   ;;  %s2072_s0 = sld [smem:[#allocation14_spill]]  ;;  %s297_s1 = scalar_lea.vmem [#allocation8], %s944_s4 }
  0x80   : > { %310 = vxpose.xlu0.b32.start [1/2] (short) %v304_v0, 128  ;;  %1006 = vmatprep.subr.mxu0 %v307_v1  ;;  %v306_v2 = vld [vmem:[%s256_s28] sm:$0xff]  ;;  %v305_v3 = vld [vmem:[%s247_s5 + $0x8] sm:$0xff]  ;;  %s2073_s26 = sld [smem:[#allocation15_spill]]  ;;  %s789_s21 = sshll.u32 %s297_s1, 4  ;;  %s1931_s21 = int_to_ptr.vmem [resolvable:$true] %s789_s21 }
  0x81   : > { %1007 = vmatpush3.msra.mxu0 %v307_v1  ;;  %s2074_s8 = sld [smem:[#allocation25_spill]]  ;;  %s774_s16 = scalar_lea.sflag [#allocation4], %s1791_s23 }
  0x82   : > { %1008 = vmatprep.subr.mxu0 %v306_v2  ;;  %s1361_s22 = scalar_lea.vmem %s1931_s21, 256  ;;  %p2075_p8 = scmp.ne.s32.totalorder %s2056_s7, 0 }
  0x83   : > { %1009 = vmatpush3.msra.mxu0 %v306_v2  ;;  %p1362_p13 = scmp.ne.s32.totalorder %s1931_s21, %s1361_s22  ;;  %s1520_s4 = smov [#allocation8]  }
  0x84   : > { %311 = vxpose.xlu0.b32.end [2/2] (short) %v305_v3, 128  ;;  %s1365_s28 = sshll.u32 %s1520_s4, 4  ;;  %s1366_s28 = int_to_ptr.vmem [resolvable:$false] %s1365_s28 }
  0x85   : > { %s965_s10 = sshll.u32 %s2072_s0, 1  ;;  %p1363_p0 = pnand %p1362_p13, %p2075_p8 }
  0x86   : > { %s966_s11 = sshll.u32 %s2073_s26, 3  ;;  %s1367_s12 = scalar_lea.vmem %s1366_s28, 512 }
  0x87   : > { %s786_s24 = sadd.s32 %s966_s11, %s965_s10  ;;  %p1364_p9 = pneg %p1363_p0 }
  0x88   : > { %s967_s5 = sshll.u32 %s786_s24, 7  ;;  %p1368_p3 = scmp.lt.s32.totalorder %s1931_s21, %s1366_s28 }
  0x89   : > { %s1936_s15 = scalar_lea.hbm %s2074_s8, %s967_s5  ;;  %p1369_p10 = scmp.lt.s32.totalorder %s1367_s12, %s1361_s22 }
  0x8b   : > { %p1370_p11 = por %p1369_p10, %p1368_p3 }
  0x8d   : > { %p1371_p12 = pnand %p1370_p11, %p1364_p9 }
  0xfc   : > { %v326_v4 = vpop.trf.xlu0 }
  0xfd   : > { %1010 = vmatprep.mubr.msk.f32.mxu0 %vm342_vm0, %v326_v4 }
 0x100   : > { %v327_v5 = vpop.trf.xlu0 }
 0x101   : > { %1011 = vmatmul.mubr.msk.f32.vlgmr.msra.gmra.mxu0 %vm342_vm0, %v327_v5 }
 0x104   : > { %v328_v6 = vpop.trf.xlu0 }
 0x105   : > { %1013 = vmatprep.mubr.msk.f32.mxu0 %vm342_vm0, %v328_v6 }
 0x108   : > { %v329_v7 = vpop.trf.xlu0 }
 0x109   : > { %1014 = vmatmul.mubr.msk.f32.gmra.mxu0 %vm342_vm0, %v329_v7 }
 0x10c   : > { %v330_v8 = vpop.trf.xlu0 }
 0x10d   : > { %1016 = vmatprep.mubr.msk.f32.mxu0 %vm342_vm0, %v330_v8 }
 0x110   : > { %v331_v9 = vpop.trf.xlu0 }
 0x111   : > { %1017 = vmatmul.mubr.msk.f32.gmra.mxu0 %vm342_vm0, %v331_v9 }
 0x114   : > { %v332_v10 = vpop.trf.xlu0 }
 0x115   : > { %1019 = vmatprep.mubr.msk.f32.mxu0 %vm342_vm0, %v332_v10 }
 0x118   : > { %v333_v11 = vpop.trf.xlu0 }
 0x119   : > { %1020 = vmatmul.mubr.msk.f32.gmra.mxu0 %vm342_vm0, %v333_v11 }
 0x11c   : > { %v334_v12 = vpop.trf.xlu0 }
 0x11d   : > { %1022 = vmatprep.mubr.msk.f32.mxu0 %vm342_vm0, %v334_v12 }
 0x120   : > { %v335_v13 = vpop.trf.xlu0 }
 0x121   : > { %1023 = vmatmul.mubr.msk.f32.gmra.mxu0 %vm342_vm0, %v335_v13 }
 0x124   : > { %v336_v14 = vpop.trf.xlu0 }
 0x125   : > { %1025 = vmatprep.mubr.msk.f32.mxu0 %vm342_vm0, %v336_v14 }
 0x128   : > { %v337_v15 = vpop.trf.xlu0 }
 0x129   : > { %1026 = vmatmul.mubr.msk.f32.gmra.mxu0 %vm342_vm0, %v337_v15 }
 0x12c   : > { %v338_v16 = vpop.trf.xlu0 }
 0x12d   : > { %1028 = vmatprep.mubr.msk.f32.mxu0 %vm342_vm0, %v338_v16 }
 0x130   : > { %v339_v17 = vpop.trf.xlu0 }
 0x131   : > { %1029 = vmatmul.mubr.msk.f32.gmra.mxu0 %vm342_vm0, %v339_v17 }
 0x134   : > { %v340_v18 = vpop.trf.xlu0 }
 0x135   : > { %1031 = vmatprep.mubr.msk.f32.mxu0 %vm342_vm0, %v340_v18 }
 0x138   : > { %v341_v19 = vpop.trf.xlu0 }
 0x139   : > { %1032 = vmatmul.mubr.msk.f32.gmra.mxu0 %vm342_vm0, %v341_v19 }
 0x1c1   : > { %v1012_v20 = vpop.f32.mrf.mxu0 }
 0x1c2   : > { %v1846_v50 = vmul.f32 0.25, %v1012_v20 }
 0x1c3   : > { %v457_v21 = vpop.f32.mrf.mxu0 }
 0x1c4   : > { %v1849_v51 = vmul.f32 0.25, %v457_v21 }
 0x1c9   : > { %v1015_v22 = vpop.f32.mrf.mxu0 }
 0x1ca   : > { %v1840_v48 = vmul.f32 0.25, %v1015_v22 }
 0x1cb   : > { %v467_v23 = vpop.f32.mrf.mxu0 }
 0x1cc   : > { %v1843_v49 = vmul.f32 0.25, %v467_v23 }
 0x1d1   : > { %v1018_v24 = vpop.f32.mrf.mxu0 }
 0x1d2   : > { %v1834_v46 = vmul.f32 0.25, %v1018_v24 }
 0x1d3   : > { %v477_v25 = vpop.f32.mrf.mxu0 }
 0x1d4   : > { %v1837_v47 = vmul.f32 0.25, %v477_v25 }
 0x1d9   : > { %v1021_v26 = vpop.f32.mrf.mxu0 }
 0x1da   : > { %v543_v44 = vmul.f32 0.25, %v1021_v26 }
 0x1db   : > { %v487_v27 = vpop.f32.mrf.mxu0 }
 0x1dc   : > { %v1831_v45 = vmul.f32 0.25, %v487_v27 }
 0x1e1   : > { %v1024_v28 = vpop.f32.mrf.mxu0 }
 0x1e2   : > { %v545_v42 = vmul.f32 0.25, %v1024_v28 }
 0x1e3   : > { %v497_v29 = vpop.f32.mrf.mxu0 }
 0x1e4   : > { %v544_v43 = vmul.f32 0.25, %v497_v29 }
 0x1e9   : > { %v1027_v30 = vpop.f32.mrf.mxu0 }
 0x1ea   : > { %v547_v40 = vmul.f32 0.25, %v1027_v30 }
 0x1eb   : > { %v507_v31 = vpop.f32.mrf.mxu0 }
 0x1ec   : > { %v546_v41 = vmul.f32 0.25, %v507_v31 }
 0x1f1   : > { %v1030_v32 = vpop.f32.mrf.mxu0 }
 0x1f2   : > { %v549_v33 = vmul.f32 0.25, %v1030_v32 }
 0x1f3   : > { %v517_v34 = vpop.f32.mrf.mxu0 }
 0x1f4   : > { %578 = vmax.xlane.f32.xlu0 %v549_v33  ;;  %v548_v39 = vmul.f32 0.25, %v517_v34 }
 0x1f9   : > { %v1033_v35 = vpop.f32.mrf.mxu0 }
 0x1fa   : > { %v551_v36 = vmul.f32 0.25, %v1033_v35 }
 0x1fb   : > { %v527_v37 = vpop.f32.mrf.mxu0 }
 0x1fc   : > { %582 = vmax.xlane.f32.xlu1 %v551_v36  ;;  %v550_v38 = vmul.f32 0.25, %v527_v37 }
 0x200   : > { %580 = vmax.xlane.f32.xlu1 %v550_v38 }
 0x204   : > { %576 = vmax.xlane.f32.xlu1 %v548_v39 }
 0x208   : > { %574 = vmax.xlane.f32.xlu1 %v547_v40 }
 0x20c   : > { %572 = vmax.xlane.f32.xlu1 %v546_v41 }
 0x210   : > { %570 = vmax.xlane.f32.xlu1 %v545_v42 }
 0x214   : > { %568 = vmax.xlane.f32.xlu1 %v544_v43 }
 0x218   : > { %566 = vmax.xlane.f32.xlu1 %v543_v44 }
 0x21c   : > { %564 = vmax.xlane.f32.xlu1 %v1831_v45 }
 0x220   : > { %562 = vmax.xlane.f32.xlu1 %v1834_v46 }
 0x224   : > { %560 = vmax.xlane.f32.xlu1 %v1837_v47 }
 0x228   : > { %558 = vmax.xlane.f32.xlu1 %v1840_v48 }
 0x22c   : > { %556 = vmax.xlane.f32.xlu1 %v1843_v49 }
 0x230   : > { %554 = vmax.xlane.f32.xlu1 %v1846_v50 }
 0x234   : > { %552 = vmax.xlane.f32.xlu1 %v1849_v51 }
 0x27d   : > { %v579_v54 = vpop.xlane.xlu0 %578 }
 0x27e   : > { %v597_v57 = vsub.f32 %v549_v33, %v579_v54 }
 0x280   : > { %v626_v61 = vmul.f32 1.442695, %v597_v57 }
 0x285   : > { %v583_v52 = vpop.xlane.xlu1 %582 }
 0x286   : > { %v599_v53 = vsub.f32 %v551_v36, %v583_v52  ;;  %v308_v52 = vld [vmem:[%s265_s30] sm:$0xff] }
 0x287   : > { %1066 = vmatprep.mubr.f32.mxu1 %v308_v52 }
 0x288   : > { %v630_v55 = vmul.f32 1.442695, %v599_v53 }
 0x289   : > { %v581_v56 = vpop.xlane.xlu1 %580 }
 0x28a   : > { %1211 = vpow2.f32 %v630_v55  ;;  %v598_v58 = vsub.f32 %v550_v38, %v581_v56 }
 0x28c   : > { %v628_v59 = vmul.f32 1.442695, %v598_v58 }
 0x28d   : > { %v577_v60 = vpop.xlane.xlu1 %576 }
 0x28e   : > { %1213 = vpow2.f32 %v628_v59  ;;  %v596_v62 = vsub.f32 %v548_v39, %v577_v60 }
 0x28f   : > { %1215 = vpow2.f32 %v626_v61 }
 0x290   : > { %v624_v0 = vmul.f32 1.442695, %v596_v62 }
 0x291   : > { %v575_v63 = vpop.xlane.xlu1 %574 }
 0x292   : > { %v595_v1 = vsub.f32 %v547_v40, %v575_v63  ;;  %1217 = vpow2.f32 %v624_v0 }
 0x294   : > { %v622_v3 = vmul.f32 1.442695, %v595_v1 }
 0x295   : > { %v573_v2 = vpop.xlane.xlu1 %572 }
 0x296   : > { %v594_v4 = vsub.f32 %v546_v41, %v573_v2  ;;  %1219 = vpow2.f32 %v622_v3 }
 0x297   : > { %v1852_v5 = vpop.eup %1211 }
 0x298   : > { %662 = vadd.xlane.f32.xlu1 %v1852_v5  ;;  %v620_v7 = vmul.f32 1.442695, %v594_v4 }
 0x299   : > { %v571_v6 = vpop.xlane.xlu1 %570 }
 0x29a   : > { %v593_v8 = vsub.f32 %v545_v42, %v571_v6  ;;  %1221 = vpow2.f32 %v620_v7 }
 0x29b   : > { %v1855_v9 = vpop.eup %1213 }
 0x29c   : > { %660 = vadd.xlane.f32.xlu1 %v1855_v9  ;;  %v618_v11 = vmul.f32 1.442695, %v593_v8  ;;  %v1858_v13 = vpop.eup %1215 }
 0x29d   : > { %v569_v10 = vpop.xlane.xlu1 %568 }
 0x29e   : > { %v592_v12 = vsub.f32 %v544_v43, %v569_v10  ;;  %1223 = vpow2.f32 %v618_v11 }
 0x29f   : > { %v1861_v17 = vpop.eup %1217 }
 0x2a0   : > { %658 = vadd.xlane.f32.xlu1 %v1858_v13  ;;  %v616_v15 = vmul.f32 1.442695, %v592_v12 }
 0x2a1   : > { %v567_v14 = vpop.xlane.xlu1 %566 }
 0x2a2   : > { %v591_v16 = vsub.f32 %v543_v44, %v567_v14  ;;  %1225 = vpow2.f32 %v616_v15 }
 0x2a3   : > { %v1865_v21 = vpop.eup %1219 }
 0x2a4   : > { %656 = vadd.xlane.f32.xlu1 %v1861_v17  ;;  %v614_v19 = vmul.f32 1.442695, %v591_v16 }
 0x2a5   : > { %v565_v18 = vpop.xlane.xlu1 %564 }
 0x2a6   : > { %v590_v20 = vsub.f32 %v1831_v45, %v565_v18  ;;  %1227 = vpow2.f32 %v614_v19 }
 0x2a7   : > { %v1869_v25 = vpop.eup %1221 }
 0x2a8   : > { %654 = vadd.xlane.f32.xlu1 %v1865_v21  ;;  %v612_v23 = vmul.f32 1.442695, %v590_v20 }
 0x2a9   : > { %v563_v22 = vpop.xlane.xlu1 %562 }
 0x2aa   : > { %v589_v24 = vsub.f32 %v1834_v46, %v563_v22  ;;  %1229 = vpow2.f32 %v612_v23 }
 0x2ab   : > { %v1873_v29 = vpop.eup %1223 }
 0x2ac   : > { %652 = vadd.xlane.f32.xlu1 %v1869_v25  ;;  %v610_v27 = vmul.f32 1.442695, %v589_v24 }
 0x2ad   : > { %v561_v26 = vpop.xlane.xlu1 %560 }
 0x2ae   : > { %v588_v28 = vsub.f32 %v1837_v47, %v561_v26  ;;  %1231 = vpow2.f32 %v610_v27 }
 0x2af   : > { %v1877_v33 = vpop.eup %1225 }
 0x2b0   : > { %650 = vadd.xlane.f32.xlu1 %v1873_v29  ;;  %v608_v31 = vmul.f32 1.442695, %v588_v28 }
 0x2b1   : > { %v559_v30 = vpop.xlane.xlu1 %558 }
 0x2b2   : > { %v587_v32 = vsub.f32 %v1840_v48, %v559_v30  ;;  %1233 = vpow2.f32 %v608_v31 }
 0x2b3   : > { %v1881_v37 = vpop.eup %1227 }
 0x2b4   : > { %648 = vadd.xlane.f32.xlu1 %v1877_v33  ;;  %v606_v34 = vmul.f32 1.442695, %v587_v32 }
 0x2b5   : > { %v557_v35 = vpop.xlane.xlu1 %556 }
 0x2b6   : > { %v586_v36 = vsub.f32 %v1843_v49, %v557_v35  ;;  %1235 = vpow2.f32 %v606_v34 }
 0x2b7   : > { %v1885_v41 = vpop.eup %1229 }
 0x2b8   : > { %v604_v38 = vmul.f32 1.442695, %v586_v36  ;;  %646 = vadd.xlane.f32.xlu1 %v1881_v37 }
 0x2b9   : > { %v555_v39 = vpop.xlane.xlu1 %554 }
 0x2ba   : > { %1237 = vpow2.f32 %v604_v38  ;;  %v585_v40 = vsub.f32 %v1846_v50, %v555_v39 }
 0x2bb   : > { %v1889_v45 = vpop.eup %1231 }
 0x2bc   : > { %v602_v42 = vmul.f32 1.442695, %v585_v40  ;;  %644 = vadd.xlane.f32.xlu1 %v1885_v41 }
 0x2bd   : > { %v553_v43 = vpop.xlane.xlu1 %552 }
 0x2be   : > { %1239 = vpow2.f32 %v602_v42  ;;  %v584_v44 = vsub.f32 %v1849_v51, %v553_v43 }
 0x2bf   : > { %v1892_v47 = vpop.eup %1233 }
 0x2c0   : > { %v600_v46 = vmul.f32 1.442695, %v584_v44  ;;  %642 = vadd.xlane.f32.xlu1 %v1889_v45 }
 0x2c2   : > { %1241 = vpow2.f32 %v600_v46 }
 0x2c3   : > { %v1895_v48 = vpop.eup %1235 }
 0x2c4   : > { %640 = vadd.xlane.f32.xlu1 %v1892_v47 }
 0x2c7   : > { %v1897_v49 = vpop.eup %1237 }
 0x2c8   : > { %636 = vadd.xlane.f32.xlu0 %v1897_v49  ;;  %638 = vadd.xlane.f32.xlu1 %v1895_v48 }
 0x2cb   : > { %v1901_v50 = vpop.eup %1239 }
 0x2cc   : > { %634 = vadd.xlane.f32.xlu1 %v1901_v50 }
 0x2cf   : > { %v1904_v51 = vpop.eup %1241 }
 0x2d0   : > { %632 = vadd.xlane.f32.xlu0 %v1904_v51 }
 0x321   : > { %v663_v53 = vpop.xlane.xlu1 %662 }
 0x322   : > { %1243 = vrcp.f32 %v663_v53 }
 0x325   : > { %v661_v54 = vpop.xlane.xlu1 %660 }
 0x326   : > { %1245 = vrcp.f32 %v661_v54 }
 0x329   : > { %v659_v55 = vpop.xlane.xlu1 %658 }
 0x32a   : > { %1247 = vrcp.f32 %v659_v55 }
 0x32d   : > { %v657_v56 = vpop.xlane.xlu1 %656 }
 0x32e   : > { %1249 = vrcp.f32 %v657_v56 }
 0x32f   : > { %v1244_v57 = vpop.eup %1243 }
 0x330   : > { %v695_v58 = vmul.f32 %v1244_v57, %v1852_v5 }
 0x331   : > { %v655_v59 = vpop.xlane.xlu1 %654 }
 0x332   : > { %1251 = vrcp.f32 %v655_v59  ;;  %1034 = vmatprep.subr.mxu1 %v695_v58 }
 0x333   : > { %v1246_v60 = vpop.eup %1245  ;;  %1035 = vmatpush3.xpose.msra.mxu1 %v695_v58 }
 0x334   : > { %v694_v61 = vmul.f32 %v1246_v60, %v1855_v9 }
 0x335   : > { %v653_v62 = vpop.xlane.xlu1 %652 }
 0x336   : > { %1253 = vrcp.f32 %v653_v62  ;;  %1036 = vmatprep.subr.mxu1 %v694_v61 }
 0x337   : > { %v1248_v63 = vpop.eup %1247  ;;  %1037 = vmatpush3.xpose.msra.mxu1 %v694_v61 }
 0x338   : > { %v693_v0 = vmul.f32 %v1248_v63, %v1858_v13 }
 0x339   : > { %v651_v1 = vpop.xlane.xlu1 %650 }
 0x33a   : > { %1255 = vrcp.f32 %v651_v1  ;;  %1038 = vmatprep.subr.mxu1 %v693_v0 }
 0x33b   : > { %v1250_v2 = vpop.eup %1249  ;;  %1039 = vmatpush3.xpose.msra.mxu1 %v693_v0 }
 0x33c   : > { %v692_v3 = vmul.f32 %v1250_v2, %v1861_v17 }
 0x33d   : > { %v649_v4 = vpop.xlane.xlu1 %648 }
 0x33e   : > { %1257 = vrcp.f32 %v649_v4  ;;  %1040 = vmatprep.subr.mxu1 %v692_v3 }
 0x33f   : > { %v1252_v5 = vpop.eup %1251  ;;  %1041 = vmatpush3.xpose.msra.mxu1 %v692_v3 }
 0x340   : > { %v691_v6 = vmul.f32 %v1252_v5, %v1865_v21 }
 0x341   : > { %v647_v7 = vpop.xlane.xlu1 %646 }
 0x342   : > { %1259 = vrcp.f32 %v647_v7  ;;  %1042 = vmatprep.subr.mxu1 %v691_v6 }
 0x343   : > { %v1254_v8 = vpop.eup %1253  ;;  %1043 = vmatpush3.xpose.msra.mxu1 %v691_v6 }
 0x344   : > { %v690_v9 = vmul.f32 %v1254_v8, %v1869_v25 }
 0x345   : > { %v645_v10 = vpop.xlane.xlu1 %644 }
 0x346   : > { %1261 = vrcp.f32 %v645_v10  ;;  %1044 = vmatprep.subr.mxu1 %v690_v9 }
 0x347   : > { %v1256_v11 = vpop.eup %1255  ;;  %1045 = vmatpush3.xpose.msra.mxu1 %v690_v9 }
 0x348   : > { %v689_v12 = vmul.f32 %v1256_v11, %v1873_v29 }
 0x349   : > { %v643_v13 = vpop.xlane.xlu1 %642 }
 0x34a   : > { %1263 = vrcp.f32 %v643_v13  ;;  %1046 = vmatprep.subr.mxu1 %v689_v12 }
 0x34b   : > { %v1258_v14 = vpop.eup %1257  ;;  %1047 = vmatpush3.xpose.msra.mxu1 %v689_v12 }
 0x34c   : > { %v688_v15 = vmul.f32 %v1258_v14, %v1877_v33 }
 0x34d   : > { %v641_v16 = vpop.xlane.xlu1 %640 }
 0x34e   : > { %1265 = vrcp.f32 %v641_v16  ;;  %1048 = vmatprep.subr.mxu1 %v688_v15 }
 0x34f   : > { %v1260_v17 = vpop.eup %1259  ;;  %1049 = vmatpush3.xpose.msra.mxu1 %v688_v15 }
 0x350   : > { %v687_v18 = vmul.f32 %v1260_v17, %v1881_v37  ;;  %v309_v37 = vld [vmem:[%s265_s30 + $0x8] sm:$0xff] }
 0x351   : > { %v639_v19 = vpop.xlane.xlu1 %638  ;;  %v637_v20 = vpop.xlane.xlu0 %636 }
 0x352   : > { %1267 = vrcp.f32 %v639_v19  ;;  %1050 = vmatprep.subr.mxu1 %v687_v18 }
 0x353   : > { %v1262_v21 = vpop.eup %1261  ;;  %1269 = vrcp.f32 %v637_v20  ;;  %1051 = vmatpush3.xpose.msra.mxu1 %v687_v18 }
 0x354   : > { %v686_v22 = vmul.f32 %v1262_v21, %v1885_v41 }
 0x355   : > { %v635_v23 = vpop.xlane.xlu1 %634 }
 0x356   : > { %1271 = vrcp.f32 %v635_v23  ;;  %1052 = vmatprep.subr.mxu1 %v686_v22 }
 0x357   : > { %v1264_v24 = vpop.eup %1263  ;;  %1053 = vmatpush3.xpose.msra.mxu1 %v686_v22 }
 0x358   : > { %v685_v25 = vmul.f32 %v1264_v24, %v1889_v45 }
 0x359   : > { %v633_v26 = vpop.xlane.xlu0 %632 }
 0x35a   : > { %1273 = vrcp.f32 %v633_v26  ;;  %1054 = vmatprep.subr.mxu1 %v685_v25 }
 0x35b   : > { %v1266_v27 = vpop.eup %1265  ;;  %1055 = vmatpush3.xpose.msra.mxu1 %v685_v25 }
 0x35c   : > { %v684_v28 = vmul.f32 %v1266_v27, %v1892_v47 }
 0x35e   : > { %1056 = vmatprep.subr.mxu1 %v684_v28 }
 0x35f   : > { %v1268_v29 = vpop.eup %1267  ;;  %1057 = vmatpush3.xpose.msra.mxu1 %v684_v28 }
 0x360   : > { %v1270_v30 = vpop.eup %1269  ;;  %v683_v31 = vmul.f32 %v1268_v29, %v1895_v48 }
 0x361   : > { %v682_v32 = vmul.f32 %v1270_v30, %v1897_v49 }
 0x362   : > { %1058 = vmatprep.subr.mxu1 %v683_v31 }
 0x363   : > { %v1272_v33 = vpop.eup %1271  ;;  %1059 = vmatpush3.xpose.msra.mxu1 %v683_v31 }
 0x364   : > { %1060 = vmatprep.subr.mxu1 %v682_v32  ;;  %v681_v34 = vmul.f32 %v1272_v33, %v1901_v50 }
 0x367   : > { %v1274_v35 = vpop.eup %1273  ;;  %1061 = vmatpush3.xpose.msra.mxu1 %v682_v32 }
 0x368   : > { %1062 = vmatprep.subr.mxu1 %v681_v34  ;;  %v680_v36 = vmul.f32 %v1274_v35, %v1904_v51 }
 0x36b   : > { %1063 = vmatpush3.xpose.msra.mxu1 %v681_v34 }
 0x36c   : > { %1064 = vmatprep.subr.mxu1 %v680_v36 }
 0x36f   : > { %1065 = vmatpush3.xpose.msra.mxu1 %v680_v36 }
 0x372   : > { %1067 = vmatmul.mubr.f32.vlgmr.msra.gmra.mxu1 %v309_v37 }
 0x432   : > { %v1068_v38 = vpop.f32.mrf.mxu1 }
 0x433   : > { %772 = vst [vmem:[%s297_s1 + $0x8] sm:$0xff] %v1068_v38 }
 0x434   : > { %v762_v39 = vpop.f32.mrf.mxu1 }
 0x435   : > { %771 = vst [vmem:[%s297_s1] sm:$0xff] %v762_v39 }
 0x436   : > { %1374 = shalt.err (!%p1371_p12)
}
 0x437   : > { %s1375_s29 = scalar_lea.hbm %s1936_s15, 256  ;;  %s1379_s26 = scalar_lea.hbm %s2074_s8, 2048 }
 0x438   : > { %p1376_p5 = scmp.ne.s32.totalorder %s1936_s15, %s1375_s29  ;;  %p1380_p4 = scmp.lt.s32.totalorder %s1936_s15, %s2074_s8 }
 0x439   : > { %p1381_p6 = scmp.lt.s32.totalorder %s1379_s26, %s1375_s29 }
 0x43a   : > { %p1377_p1 = pnand %p1376_p5, %p2075_p8 }
 0x43b   : > { %p1382_p2 = por %p1381_p6, %p1380_p4 }
 0x43c   : > { %p1378_p7 = pneg %p1377_p1 }
 0x43e   : > { %p1383_p13 = pnand %p1382_p2, %p1378_p7 }
 0x440   : > { %1386 = shalt.err (!%p1383_p13)
}
 0x441   : > { %s1521_s24 = smov 128   ;;  %s1522_s1 = smov 8  }
 0x442   : > { %1076 = dma.vmem_to_hbm [thread:$0]  (%p2075_p8), %s1931_s21, 256, %s1936_s15, %s774_s16, %s1521_s24, %s1521_s24, %s1522_s1  }
 0x443 PF: > { %p1093_p0 = scmp.ge.s32.totalorder %s1513_s25, 2  ;;  %s804_s5 = sand.u32 1, %s1485_s18  }
 0x444   : > { %p2076_p9 = scmp.ne.s32.totalorder %s2057_s6, 0  ;;  %s805_s3 = scalar_lea.sflag [#allocation4], %s804_s5 }
 0x446   : > { %p1089_p3 = pnand %p1093_p0, %p2076_p9 }
 0x448   : > { %p1090_p10 = pneg %p1089_p3 }
 0x44a   : > { %1456 = dma.done.wait (%p1090_p10), %s805_s3, 256  }
 0x44b   : > { %1458 = vsyncadd (%p1090_p10), %s805_s3, 4294967040  ;;  %s22_s25 = sadd.s32 1, %s1513_s25   ;;  %s2078_s15 = sld [smem:[#allocation13_spill]] }
 0x44c   : > { %p1966_p11 = scmp.ge.s32.totalorder %s22_s25, 10   ;;  %s2079_s7 = sld [smem:[#allocation21_spill]] }
 0x44d   : > { %s2080_s21 = sld [smem:[#allocation16_spill]]  ;;  %s2084_s12 = smov %s1465_s13 }
 0x44e   : > { %s2081_s22 = sld [smem:[#allocation17_spill]]  ;;  %s2085_s13 = smov %s1469_s14 }
 0x44f   : > { %s2082_s23 = sld [smem:[#allocation18_spill]]  ;;  %s2086_s14 = smov %s1755_s27 }
 0x450   : > { %s2083_s24 = sld [smem:[#allocation19_spill]]  ;;  %s2087_s16 = smov %s1481_s17 }
 0x451   : > { %s2089_s18 = smov %s1489_s19  ;;  %s2090_s19 = smov %s1493_s20 }
 0x452   : > { %s2088_s17 = smov %s2079_s7  ;;  %s2091_s20 = smov %s1715_s2 }
 0x453   :  { %21 = sbr.rel (!%p1966_p11) target bundleno = 17 (0x11), region = 101 }
 0x458   :  { %810 = vsyncpa [#allocation3], 1 }
 0x459   :  { %812 = vsyncpa [#allocation3 + $0x1], 1 }
 0x45a   :  { %813 = vsyncpa [#allocation6], 1 }
 0x45b   :  { %815 = vsyncpa [#allocation6 + $0x1], 1 }
 0x45c   :  { %816 = vsyncpa [#allocation4], 1 }
 0x45d   :  { %818 = vsyncpa [#allocation4 + $0x1], 1 }

</bundles_post_ra>
